<compile_context>
chip_gen: v6e
topology: v6e:2x2x1
jax: 0.10.0
libtpu: 0.0.40
codegen_flags: <defaults>
</compile_context>

<pallas_src>
import jax
import jax.numpy as jnp
from jax.experimental import pallas as pl
from jax.experimental.pallas import tpu as pltpu

LANE = 128  # TPU lane width


def qnet_kernel(x_ref, w1_ref, b1_ref, w2_ref, b2_ref, o_ref):
    # fc1: (TB, D_in) @ (D_in, H) + (1, H)
    h = jnp.dot(x_ref[...], w1_ref[...], preferred_element_type=jnp.float32)
    # bias + ReLU epilogue in f32 on the VPU
    h = jnp.maximum(h + b1_ref[...], 0.0)
    # fc2: (TB, H) @ (H, D_out_pad) + (1, D_out_pad)  -> lane-dense output tile
    out = jnp.dot(h.astype(w2_ref.dtype), w2_ref[...],
                  preferred_element_type=jnp.float32)
    o_ref[...] = (out + b2_ref[...]).astype(o_ref.dtype)


def _round_up(n, m):
    return ((n + m - 1) // m) * m


def q_net_forward(x, w1, b1, w2, b2, *, block_b=128):
    """Fused MLP forward, batch-tiled with weights resident in VMEM.

    x : (B, D_in)        w1: (D_in, H)   b1: (1, H)
    w2: (H, D_out)       b2: (1, D_out)
    Returns (B, D_out).
    """
    batch, d_in = x.shape
    hidden = w1.shape[1]
    d_out = w2.shape[1]

    # ---- lane-dense padding (hidden and output last dims -> multiples of 128)
    h_pad = _round_up(hidden, LANE)
    o_pad = _round_up(d_out, LANE)

    w1p = jnp.pad(w1, ((0, 0), (0, h_pad - hidden)))
    b1p = jnp.pad(b1, ((0, 0), (0, h_pad - hidden)))
    w2p = jnp.pad(w2, ((0, h_pad - hidden), (0, o_pad - d_out)))
    b2p = jnp.pad(b2, ((0, 0), (0, o_pad - d_out)))

    # ---- batch tiling (multiple of 8 sublanes; 128 works well for f32)
    tb = min(block_b, _round_up(batch, 8))
    b_padded = _round_up(batch, tb)
    xp = jnp.pad(x, ((0, b_padded - batch), (0, 0)))
    grid = (b_padded // tb,)

    # Weights/biases: full-array blocks whose index_map ignores the batch index
    # -> block index is constant across the grid, so they stay resident in VMEM.
    resident = lambda shape: pl.BlockSpec(shape, lambda i: (0,) * len(shape))

    out_padded = pl.pallas_call(
        qnet_kernel,
        out_shape=jax.ShapeDtypeStruct((b_padded, o_pad), x.dtype),
        grid=grid,
        in_specs=[
            pl.BlockSpec((tb, d_in), lambda i: (i, 0)),   # x: streamed per tile
            resident(w1p.shape),                          # (D_in, H_pad)
            resident(b1p.shape),                          # (1, H_pad)
            resident(w2p.shape),                          # (H_pad, D_out_pad)
            resident(b2p.shape),                          # (1, D_out_pad)
        ],
        out_specs=pl.BlockSpec((tb, o_pad), lambda i: (i, 0)),
        compiler_params=pltpu.CompilerParams(
            dimension_semantics=("parallel",)),
    )(xp, w1p, b1p, w2p, b2p)

    # Slice the real logits / real batch rows back out.
    return out_padded[:batch, :d_out]


def init_linear_params(key, in_features, out_features, dtype=jnp.float32):
    """Deterministic init mimicking torch.nn.Linear default (uniform +-1/sqrt(in))."""
    kw, kb = jax.random.split(key)
    bound = 1.0 / jnp.sqrt(jnp.asarray(in_features, dtype))
    # stored as (in, out): transpose of PyTorch's (out, in)
    w = jax.random.uniform(kw, (in_features, out_features), dtype,
                           minval=-bound, maxval=bound)
    b = jax.random.uniform(kb, (1, out_features), dtype,
                           minval=-bound, maxval=bound)
    return w, b


if __name__ == "__main__":
    # Q-network shapes: state dim -> hidden_dim=128 (per module) -> #actions.
    # Batch of 256 states (e.g. a replay-buffer minibatch) so the batch grid
    # actually has >1 tile and the launch/DMA cost is amortized.
    batch = 256
    input_dim = 4
    hidden_dim = 128
    output_dim = 2

    key = jax.random.PRNGKey(0)
    k_x, k_fc1, k_fc2 = jax.random.split(key, 3)

    x = jax.random.normal(k_x, (batch, input_dim), jnp.float32)
    w1, b1 = init_linear_params(k_fc1, input_dim, hidden_dim)
    w2, b2 = init_linear_params(k_fc2, hidden_dim, output_dim)

    out = q_net_forward(x, w1, b1, w2, b2)
    out = jax.block_until_ready(out)

    # reference check in plain JAX
    ref = jnp.maximum(x @ w1 + b1, 0.0) @ w2 + b2
    assert out.shape == (batch, output_dim), out.shape
    assert jnp.allclose(out, ref, atol=1e-5, rtol=1e-5)

    print("KERNEL_OK")
</pallas_src>

<mosaic_0001>
module attributes {stable_mosaic.version = 11 : i64} {
  func.func @qnet_kernel(%arg0: i32, %arg1: memref<128x4xf32, #tpu.memory_space<vmem>>, %arg2: memref<4x128xf32, #tpu.memory_space<vmem>>, %arg3: memref<1x128xf32, #tpu.memory_space<vmem>>, %arg4: memref<128x128xf32, #tpu.memory_space<vmem>>, %arg5: memref<1x128xf32, #tpu.memory_space<vmem>>, %arg6: memref<128x128xf32, #tpu.memory_space<vmem>>) attributes {dimension_semantics = [#tpu.dimension_semantics<parallel>], iteration_bounds = array<i64: 2>, scalar_prefetch = 0 : i64, scratch_operands = 0 : i64, tpu.core_type = #tpu.core_type<tc>, window_params = [{transform_indices = @transform_0, window_bounds = array<i64: 128, 4>}, {pipeline_mode = #tpu.pipeline_mode<synchronous>, transform_indices = @transform_1, window_bounds = array<i64: 4, 128>}, {pipeline_mode = #tpu.pipeline_mode<synchronous>, transform_indices = @transform_2, window_bounds = array<i64: 1, 128>}, {pipeline_mode = #tpu.pipeline_mode<synchronous>, transform_indices = @transform_3, window_bounds = array<i64: 128, 128>}, {pipeline_mode = #tpu.pipeline_mode<synchronous>, transform_indices = @transform_4, window_bounds = array<i64: 1, 128>}, {transform_indices = @transform_5, window_bounds = array<i64: 128, 128>}]} {
    %c0 = arith.constant 0 : index
    %c0_0 = arith.constant 0 : index
    %0 = vector.load %arg1[%c0, %c0_0] : memref<128x4xf32, #tpu.memory_space<vmem>>, vector<128x4xf32>
    %c0_1 = arith.constant 0 : index
    %c0_2 = arith.constant 0 : index
    %1 = vector.load %arg2[%c0_1, %c0_2] : memref<4x128xf32, #tpu.memory_space<vmem>>, vector<4x128xf32>
    %cst = arith.constant dense<0.000000e+00> : vector<128x128xf32>
    %2 = tpu.matmul %0, %1, %cst {dimension_numbers = #tpu.dot_dimension_numbers<[1], [0], [0], [1], [0, 0, 1, 1], [], []>} : vector<128x4xf32>, vector<4x128xf32>, vector<128x128xf32> -> vector<128x128xf32>
    %c0_3 = arith.constant 0 : index
    %c0_4 = arith.constant 0 : index
    %3 = vector.load %arg3[%c0_3, %c0_4] : memref<1x128xf32, #tpu.memory_space<vmem>>, vector<1x128xf32>
    %4 = vector.broadcast %3 : vector<1x128xf32> to vector<128x128xf32>
    %5 = arith.addf %2, %4 : vector<128x128xf32>
    %cst_5 = arith.constant 0.000000e+00 : f32
    %6 = vector.broadcast %cst_5 : f32 to vector<128x128xf32>
    %7 = arith.maximumf %5, %6 : vector<128x128xf32>
    %c0_6 = arith.constant 0 : index
    %c0_7 = arith.constant 0 : index
    %8 = vector.load %arg4[%c0_6, %c0_7] : memref<128x128xf32, #tpu.memory_space<vmem>>, vector<128x128xf32>
    %cst_8 = arith.constant dense<0.000000e+00> : vector<128x128xf32>
    %9 = tpu.matmul %7, %8, %cst_8 {dimension_numbers = #tpu.dot_dimension_numbers<[1], [0], [0], [1], [0, 0, 1, 1], [], []>} : vector<128x128xf32>, vector<128x128xf32>, vector<128x128xf32> -> vector<128x128xf32>
    %c0_9 = arith.constant 0 : index
    %c0_10 = arith.constant 0 : index
    %10 = vector.load %arg5[%c0_9, %c0_10] : memref<1x128xf32, #tpu.memory_space<vmem>>, vector<1x128xf32>
    %11 = vector.broadcast %10 : vector<1x128xf32> to vector<128x128xf32>
    %12 = arith.addf %9, %11 : vector<128x128xf32>
    %c0_11 = arith.constant 0 : index
    %c0_12 = arith.constant 0 : index
    %13 = vector.load %arg6[%c0_11, %c0_12] : memref<128x128xf32, #tpu.memory_space<vmem>>, vector<128x128xf32>
    tpu.vector_store %arg6[%c0_11, %c0_12], %12 {strides = array<i32>} : memref<128x128xf32, #tpu.memory_space<vmem>>, vector<128x128xf32>,
    return
  }
  func.func @transform_0(%arg0: i32) -> (i32, i32) {
    %c0_i32 = arith.constant 0 : i32
    %c0_i32_0 = arith.constant 0 : i32
    return %arg0, %c0_i32 : i32, i32
  }
  func.func @transform_1(%arg0: i32) -> (i32, i32) {
    %c0_i32 = arith.constant 0 : i32
    %c0_i32_0 = arith.constant 0 : i32
    %c0_i32_1 = arith.constant 0 : i32
    return %c0_i32, %c0_i32_0 : i32, i32
  }
  func.func @transform_2(%arg0: i32) -> (i32, i32) {
    %c0_i32 = arith.constant 0 : i32
    %c0_i32_0 = arith.constant 0 : i32
    %c0_i32_1 = arith.constant 0 : i32
    return %c0_i32, %c0_i32_0 : i32, i32
  }
  func.func @transform_3(%arg0: i32) -> (i32, i32) {
    %c0_i32 = arith.constant 0 : i32
    %c0_i32_0 = arith.constant 0 : i32
    %c0_i32_1 = arith.constant 0 : i32
    return %c0_i32, %c0_i32_0 : i32, i32
  }
  func.func @transform_4(%arg0: i32) -> (i32, i32) {
    %c0_i32 = arith.constant 0 : i32
    %c0_i32_0 = arith.constant 0 : i32
    %c0_i32_1 = arith.constant 0 : i32
    return %c0_i32, %c0_i32_0 : i32, i32
  }
  func.func @transform_5(%arg0: i32) -> (i32, i32) {
    %c0_i32 = arith.constant 0 : i32
    %c0_i32_0 = arith.constant 0 : i32
    return %arg0, %c0_i32 : i32, i32
  }
}

</mosaic_0001>

<bundles_post_ra>
// kernel: tpu_custom_call.1
= control target key start
LH: loop header
LB: loop body
LE: loop exit
PB: predicated region body
PF: predicated region fallthrough
CT: control target
= control target key end

     0   :  { %10 = vsyncpa [#allocation3], 0  ;;  %s1270_s0 = inlined_call_operand.vmem [shape: f32[256,4], index: 0, kind: input, shape index: {}]   ;;  %s1271_s1 = inlined_call_operand.vmem [shape: f32[4,128], index: 1, kind: input, shape index: {}]   ;;  %s1272_s2 = inlined_call_operand.vmem [shape: f32[1,128], index: 2, kind: input, shape index: {}]   ;;  %s1273_s3 = inlined_call_operand.vmem [shape: f32[128,128], index: 3, kind: input, shape index: {}]   ;;  %s1274_s4 = inlined_call_operand.vmem [shape: f32[1,128], index: 4, kind: input, shape index: {}]   ;;  %s1275_s5 = inlined_call_operand.hbm [shape: f32[256,128], index: 5, kind: output, shape index: {}]  }
   0x1   :  { %12 = vsyncpa [#allocation3 + $0x1], 0  ;;  %s1055_s18 = smov 0   ;;  %s1057_s19 = smov 0  }
   0x2   :  { %s1059_s20 = smov 0   ;;  %s1061_s21 = smov 0  }
   0x3 LB: > { %s1076_s22 = sadd.s32 4294967295, %s1020_s21   ;;  %s724_s23 = sadd.s32 4294967294, %s1020_s21   ;;  %s1020_s21 = sphi %s1061_s21, %s1281_s21   ;;  %s1016_s20 = sphi %s1059_s20, %s1280_s20   ;;  %s1012_s19 = sphi %s1057_s19, %s1279_s19   ;;  %s1008_s18 = sphi %s1055_s18, %s1278_s18  }
   0x4   : > { %s1080_s24 = sadd.s32 1, %s1020_s21   ;;  %s135_s25 = sadd.s32 1, %s1016_s20 }
   0x5   : > { %s132_s26 = ssub.s32 %s1020_s21, %s1080_s24  ;;  %p145_p0 = scmp.ne.s32.totalorder %s1016_s20, %s1012_s19 }
   0x6   : > { %p133_p1 = scmp.eq.s32.totalorder %s132_s26, 0  ;;  %p146_p2 = scmp.eq.s32.totalorder %s1076_s22, 1 }
   0x7   : > { %p151_p3 = scmp.ne.s32.totalorder %s1012_s19, %s1008_s18  ;;  %p152_p4 = scmp.eq.s32.totalorder %s724_s23, 1 }
   0x8   : > { %s1091_s27 = scalar_select %p133_p1, %s1016_s20, %s135_s25  }
   0x9   : > { %p1093_p5 = por %p146_p2, %p145_p0  ;;  %p1097_p6 = por %p152_p4, %p151_p3 }
   0xa   : > { %p727_p7 = scmp.ge.s32.totalorder %s1020_s21, 1  ;;  %p191_p8 = scmp.lt.s32.totalorder %s1020_s21, 3 }
   0xc   : > { %p192_p9 = pnand %p727_p7, %p191_p8 }
   0xd   : > { %s729_s7 = sshll.u32 (!%p192_p9), %s1076_s22, 4  ;;  %s755_s26 = sshll.u32 (!%p192_p9), %s1076_s22, 11 }
   0xe   : > { %195 = sbr.rel (%p192_p9) target bundleno = 465 (0x1d1), region = 40  ;;  %p220_p10 = scmp.lt.s32.totalorder (!%p192_p9), %s729_s7, 31 }
   0xf   : > { %s1222_s8 = scalar_lea.hbm (!%p192_p9), %s1275_s5, %s755_s26  ;;  %s1022_s9 = smov (!%p192_p9), [#allocation2]  }
  0x10   : > { %s964_s10 = sshll.u32 (!%p192_p9), %s1022_s9, 4  ;;  %s965_s10 = int_to_ptr.vmem [resolvable:$false] %s964_s10 }
  0x11   : > { %s966_s11 = scalar_lea.vmem (!%p192_p9), %s965_s10, 4096 }
  0x13   : > { %v242_v0 = vld [vmem:[%s1271_s1] sm:$0xf]  ;;  %vm299_vm0 = vcmask 1043456   ;;  %v479_v1 = vld [vmem:[%s1273_s3 + $0x78] sm:$0xff]  ;;  %v478_v2 = vld [vmem:[%s1273_s3 + $0x70] sm:$0xff]  ;;  %s1283_s7 = smov (!%p220_p10, %s729_s7), 31 }
  0x14   : > { %805 = vmatprep.subr.msk.mxu0 %vm299_vm0, %v242_v0  ;;  %887 = vmatprep.subr.mxu1 %v479_v1  ;;  %v477_v3 = vld [vmem:[%s1273_s3 + $0x68] sm:$0xff]  ;;  %s730_s14 = sshll.u32 %s1283_s7, 3  ;;  %vm250_vm1 = vcmask 31744   ;;  %v476_v4 = vld [vmem:[%s1273_s3 + $0x60] sm:$0xff]  ;;  %v475_v8 = vld [vmem:[%s1273_s3 + $0x58] sm:$0xff] }
  0x15   : > { %806 = vmatpush3.msk.msra.mxu0 %vm299_vm0, %v242_v0  ;;  %903 = vmatpush3.msra.mxu1 %v479_v1  ;;  %s1119_s17 = scalar_lea.vmem %s1270_s0, %s730_s14  ;;  %v474_v11 = vld [vmem:[%s1273_s3 + $0x50] sm:$0xff]  ;;  %v473_v14 = vld [vmem:[%s1273_s3 + $0x48] sm:$0xff]  ;;  %v472_v17 = vld [vmem:[%s1273_s3 + $0x40] sm:$0xff]  ;;  %s216_s14 = sand.u32 1, %s1012_s19  }
  0x16   : > { %831 = vmatprep.subr.mxu0 %v479_v1  ;;  %888 = vmatprep.subr.mxu1 %v478_v2  ;;  %v226_v5 = vld [vmem:[%s1119_s17] sm:$0xff]  ;;  %v227_v6 = vld [vmem:[%s1119_s17 + $0x8] sm:$0xff]  ;;  %v228_v7 = vld [vmem:[%s1119_s17 + $0x10] sm:$0xff]  ;;  %s728_s15 = sshll.u32 %s216_s14, 7  ;;  %s1230_s22 = scalar_lea.sflag [#allocation3], %s216_s14 }
  0x17   : > { %904 = vmatpush3.msra.mxu1 %v478_v2  ;;  %807 = vmatprep.mubr.msk.f32.mxu0 %vm250_vm1, %v226_v5  ;;  %v229_v9 = vld [vmem:[%s1119_s17 + $0x18] sm:$0xff]  ;;  %v230_v10 = vld [vmem:[%s1119_s17 + $0x20] sm:$0xff]  ;;  %v231_v12 = vld [vmem:[%s1119_s17 + $0x28] sm:$0xff]  ;;  %s1201_s25 = scalar_lea.vmem [#allocation2], %s728_s15 }
  0x18   : > { %889 = vmatprep.subr.mxu1 %v477_v3  ;;  %808 = vmatmul.mubr.msk.f32.vlgmr.msra.gmra.mxu0 %vm250_vm1, %v227_v6  ;;  %v232_v13 = vld [vmem:[%s1119_s17 + $0x30] sm:$0xff]  ;;  %v233_v15 = vld [vmem:[%s1119_s17 + $0x38] sm:$0xff]  ;;  %v234_v16 = vld [vmem:[%s1119_s17 + $0x40] sm:$0xff]  ;;  %s662_s30 = sshll.u32 %s1201_s25, 4  ;;  %s1224_s30 = int_to_ptr.vmem [resolvable:$true] %s662_s30 }
  0x19   : > { %905 = vmatpush3.msra.mxu1 %v477_v3  ;;  %810 = vmatprep.mubr.msk.f32.mxu0 %vm250_vm1, %v228_v7  ;;  %v235_v18 = vld [vmem:[%s1119_s17 + $0x48] sm:$0xff]  ;;  %v471_v19 = vld [vmem:[%s1273_s3 + $0x38] sm:$0xff]  ;;  %v236_v20 = vld [vmem:[%s1119_s17 + $0x50] sm:$0xff]  ;;  %p967_p0 = scmp.lt.s32.totalorder %s1224_s30, %s965_s10 }
  0x1a   : > { %890 = vmatprep.subr.mxu1 %v476_v4  ;;  %832 = vmatpush3.msra.mxu0 %v479_v1  ;;  %v470_v21 = vld [vmem:[%s1273_s3 + $0x30] sm:$0xff]  ;;  %v237_v22 = vld [vmem:[%s1119_s17 + $0x58] sm:$0xff]  ;;  %v469_v23 = vld [vmem:[%s1273_s3 + $0x28] sm:$0xff] }
  0x1b   : > { %906 = vmatpush3.msra.mxu1 %v476_v4  ;;  %833 = vmatprep.subr.mxu0 %v478_v2  ;;  %v238_v24 = vld [vmem:[%s1119_s17 + $0x60] sm:$0xff]  ;;  %v239_v26 = vld [vmem:[%s1119_s17 + $0x68] sm:$0xff]  ;;  %v240_v27 = vld [vmem:[%s1119_s17 + $0x70] sm:$0xff] }
  0x1c   : > { %891 = vmatprep.subr.mxu1 %v475_v8  ;;  %834 = vmatpush3.msra.mxu0 %v478_v2  ;;  %v468_v25 = vld [vmem:[%s1273_s3 + $0x20] sm:$0xff]  ;;  %v241_v28 = vld [vmem:[%s1119_s17 + $0x78] sm:$0xff]  ;;  %v466_v30 = vld [vmem:[%s1273_s3 + $0x10] sm:$0xff]  ;;  %s960_s17 = scalar_lea.vmem %s1224_s30, 2048 }
  0x1d   : > { %907 = vmatpush3.msra.mxu1 %v475_v8  ;;  %811 = vmatmul.mubr.msk.f32.gmra.mxu0 %vm250_vm1, %v229_v9  ;;  %v467_v29 = vld [vmem:[%s1273_s3 + $0x18] sm:$0xff]  ;;  %v465_v31 = vld [vmem:[%s1273_s3 + $0x8] sm:$0xff]  ;;  %v464_v32 = vld [vmem:[%s1273_s3] sm:$0xff]  ;;  %p961_p11 = scmp.ne.s32.totalorder %s1224_s30, %s960_s17  ;;  %p968_p1 = scmp.lt.s32.totalorder %s966_s11, %s960_s17 }
  0x1e   : > { %892 = vmatprep.subr.mxu1 %v474_v11  ;;  %835 = vmatprep.subr.mxu0 %v477_v3  ;;  %v731_v33 = vld [vmem:[%s1272_s2] ss:$0 sm:$0xff] }
  0x1f   : > { %813 = vmatprep.mubr.msk.f32.mxu0 %vm250_vm1, %v230_v10  ;;  %836 = vmatpush3.msra.mxu0 %v477_v3  ;;  %p962_p12 = pnand %p961_p11, %p1093_p5  ;;  %p969_p2 = por %p968_p1, %p967_p0 }
  0x20   : > { %837 = vmatprep.subr.mxu0 %v476_v4  ;;  %908 = vmatpush3.msra.mxu1 %v474_v11 }
  0x21   : > { %838 = vmatpush3.msra.mxu0 %v476_v4  ;;  %893 = vmatprep.subr.mxu1 %v473_v14  ;;  %p963_p13 = pneg %p962_p12 }
  0x22   : > { %814 = vmatmul.mubr.msk.f32.gmra.mxu0 %vm250_vm1, %v231_v12  ;;  %839 = vmatprep.subr.mxu0 %v475_v8 }
  0x23   : > { %816 = vmatprep.mubr.msk.f32.mxu0 %vm250_vm1, %v232_v13  ;;  %840 = vmatpush3.msra.mxu0 %v475_v8  ;;  %p970_p3 = pnand %p969_p2, %p963_p13 }
  0x24   : > { %841 = vmatprep.subr.mxu0 %v474_v11  ;;  %909 = vmatpush3.msra.mxu1 %v473_v14 }
  0x25   : > { %842 = vmatpush3.msra.mxu0 %v474_v11  ;;  %894 = vmatprep.subr.mxu1 %v472_v17 }
  0x26   : > { %817 = vmatmul.mubr.msk.f32.gmra.mxu0 %vm250_vm1, %v233_v15  ;;  %843 = vmatprep.subr.mxu0 %v473_v14 }
  0x27   : > { %819 = vmatprep.mubr.msk.f32.mxu0 %vm250_vm1, %v234_v16  ;;  %844 = vmatpush3.msra.mxu0 %v473_v14 }
  0x28   : > { %845 = vmatprep.subr.mxu0 %v472_v17  ;;  %910 = vmatpush3.msra.mxu1 %v472_v17 }
  0x29   : > { %846 = vmatpush3.msra.mxu0 %v472_v17  ;;  %895 = vmatprep.subr.mxu1 %v471_v19 }
  0x2a   : > { %820 = vmatmul.mubr.msk.f32.gmra.mxu0 %vm250_vm1, %v235_v18  ;;  %847 = vmatprep.subr.mxu0 %v471_v19  ;;  %v749_v18 = vld [vmem:[%s1274_s4] ss:$0 sm:$0xff] }
  0x2b   : > { %822 = vmatprep.mubr.msk.f32.mxu0 %vm250_vm1, %v236_v20  ;;  %848 = vmatpush3.msra.mxu0 %v471_v19 }
  0x2c   : > { %849 = vmatprep.subr.mxu0 %v470_v21  ;;  %911 = vmatpush3.msra.mxu1 %v471_v19 }
  0x2d   : > { %850 = vmatpush3.msra.mxu0 %v470_v21  ;;  %896 = vmatprep.subr.mxu1 %v470_v21 }
  0x2e   : > { %823 = vmatmul.mubr.msk.f32.gmra.mxu0 %vm250_vm1, %v237_v22  ;;  %851 = vmatprep.subr.mxu0 %v469_v23 }
  0x2f   : > { %825 = vmatprep.mubr.msk.f32.mxu0 %vm250_vm1, %v238_v24  ;;  %852 = vmatpush3.msra.mxu0 %v469_v23 }
  0x30   : > { %853 = vmatprep.subr.mxu0 %v468_v25  ;;  %912 = vmatpush3.msra.mxu1 %v470_v21 }
  0x31   : > { %854 = vmatpush3.msra.mxu0 %v468_v25  ;;  %897 = vmatprep.subr.mxu1 %v469_v23 }
  0x32   : > { %826 = vmatmul.mubr.msk.f32.gmra.mxu0 %vm250_vm1, %v239_v26  ;;  %913 = vmatpush3.msra.mxu1 %v469_v23 }
  0x33   : > { %828 = vmatprep.mubr.msk.f32.mxu0 %vm250_vm1, %v240_v27  ;;  %898 = vmatprep.subr.mxu1 %v468_v25 }
  0x34   : > { %914 = vmatpush3.msra.mxu1 %v468_v25  ;;  %855 = vmatprep.subr.mxu0 %v467_v29 }
  0x35   : > { %899 = vmatprep.subr.mxu1 %v467_v29  ;;  %856 = vmatpush3.msra.mxu0 %v467_v29 }
  0x36   : > { %829 = vmatmul.mubr.msk.f32.gmra.mxu0 %vm250_vm1, %v241_v28  ;;  %915 = vmatpush3.msra.mxu1 %v467_v29 }
  0x37   : > { %857 = vmatprep.subr.mxu0 %v466_v30  ;;  %900 = vmatprep.subr.mxu1 %v466_v30 }
  0x38   : > { %858 = vmatpush3.msra.mxu0 %v466_v30  ;;  %916 = vmatpush3.msra.mxu1 %v466_v30 }
  0x39   : > { %859 = vmatprep.subr.mxu0 %v465_v31  ;;  %901 = vmatprep.subr.mxu1 %v465_v31 }
  0x3a   : > { %860 = vmatpush3.msra.mxu0 %v465_v31  ;;  %917 = vmatpush3.msra.mxu1 %v465_v31 }
  0x3b   : > { %861 = vmatprep.subr.mxu0 %v464_v32  ;;  %902 = vmatprep.subr.mxu1 %v464_v32 }
  0x3c   : > { %862 = vmatpush3.msra.mxu0 %v464_v32  ;;  %918 = vmatpush3.msra.mxu1 %v464_v32 }
  0xd8   : > { %v809_v34 = vpop.f32.mrf.mxu0 }
  0xd9   : > { %v375_v35 = vadd.f32 %v809_v34, %v731_v33 }
  0xda   : > { %v369_v36 = vpop.f32.mrf.mxu0 }
  0xdb   : > { %v370_v37 = vadd.f32 %v731_v33, %v369_v36  ;;  %v449_v40 = vmax.f32 %v375_v35, 0.0 }
  0xdd   : > { %v812_v38 = vpop.f32.mrf.mxu0  ;;  %v448_v39 = vmax.f32 %v370_v37, 0.0 }
  0xde   : > { %v385_v41 = vadd.f32 %v812_v38, %v731_v33 }
  0xdf   : > { %v379_v42 = vpop.f32.mrf.mxu0  ;;  %863 = vmatprep.mubr.f32.mxu0 %v448_v39 }
  0xe0   : > { %v380_v43 = vadd.f32 %v731_v33, %v379_v42  ;;  %864 = vmatmul.mubr.f32.vlgmr.msra.gmra.mxu0 %v449_v40  ;;  %v451_v46 = vmax.f32 %v385_v41, 0.0 }
  0xe2   : > { %v815_v44 = vpop.f32.mrf.mxu0  ;;  %v450_v45 = vmax.f32 %v380_v43, 0.0 }
  0xe3   : > { %v395_v47 = vadd.f32 %v815_v44, %v731_v33 }
  0xe4   : > { %v389_v48 = vpop.f32.mrf.mxu0  ;;  %866 = vmatprep.mubr.f32.mxu0 %v450_v45 }
  0xe5   : > { %v390_v49 = vadd.f32 %v731_v33, %v389_v48  ;;  %867 = vmatmul.mubr.f32.gmra.mxu0 %v451_v46  ;;  %v453_v52 = vmax.f32 %v395_v47, 0.0 }
  0xe6   : > { %v818_v50 = vpop.f32.mrf.mxu0 }
  0xe7   : > { %v452_v51 = vmax.f32 %v390_v49, 0.0  ;;  %v405_v53 = vadd.f32 %v818_v50, %v731_v33 }
  0xe8   : > { %v399_v54 = vpop.f32.mrf.mxu0 }
  0xe9   : > { %869 = vmatprep.mubr.f32.mxu0 %v452_v51  ;;  %v400_v55 = vadd.f32 %v731_v33, %v399_v54  ;;  %v455_v58 = vmax.f32 %v405_v53, 0.0 }
  0xea   : > { %v821_v56 = vpop.f32.mrf.mxu0  ;;  %870 = vmatmul.mubr.f32.gmra.mxu0 %v453_v52 }
  0xeb   : > { %v454_v57 = vmax.f32 %v400_v55, 0.0  ;;  %v415_v59 = vadd.f32 %v821_v56, %v731_v33 }
  0xec   : > { %v409_v60 = vpop.f32.mrf.mxu0 }
  0xed   : > { %v410_v61 = vadd.f32 %v731_v33, %v409_v60  ;;  %872 = vmatprep.mubr.f32.mxu1 %v454_v57  ;;  %v457_v0 = vmax.f32 %v415_v59, 0.0 }
  0xee   : > { %v824_v62 = vpop.f32.mrf.mxu0  ;;  %873 = vmatmul.mubr.f32.vlgmr.msra.gmra.mxu1 %v455_v58 }
  0xef   : > { %v456_v63 = vmax.f32 %v410_v61, 0.0  ;;  %v425_v1 = vadd.f32 %v824_v62, %v731_v33 }
  0xf0   : > { %v419_v2 = vpop.f32.mrf.mxu0 }
  0xf1   : > { %v420_v3 = vadd.f32 %v731_v33, %v419_v2  ;;  %875 = vmatprep.mubr.f32.mxu1 %v456_v63  ;;  %v459_v6 = vmax.f32 %v425_v1, 0.0 }
  0xf2   : > { %v827_v4 = vpop.f32.mrf.mxu0  ;;  %876 = vmatmul.mubr.f32.gmra.mxu1 %v457_v0 }
  0xf3   : > { %v458_v5 = vmax.f32 %v420_v3, 0.0  ;;  %v435_v7 = vadd.f32 %v827_v4, %v731_v33 }
  0xf4   : > { %v429_v8 = vpop.f32.mrf.mxu0 }
  0xf5   : > { %v430_v9 = vadd.f32 %v731_v33, %v429_v8  ;;  %878 = vmatprep.mubr.f32.mxu1 %v458_v5  ;;  %v461_v12 = vmax.f32 %v435_v7, 0.0 }
  0xf6   : > { %v830_v10 = vpop.f32.mrf.mxu0  ;;  %879 = vmatmul.mubr.f32.gmra.mxu1 %v459_v6 }
  0xf7   : > { %v460_v11 = vmax.f32 %v430_v9, 0.0  ;;  %v445_v13 = vadd.f32 %v830_v10, %v731_v33 }
  0xf8   : > { %v439_v14 = vpop.f32.mrf.mxu0 }
  0xf9   : > { %v440_v15 = vadd.f32 %v731_v33, %v439_v14  ;;  %881 = vmatprep.mubr.f32.mxu1 %v460_v11  ;;  %v463_v17 = vmax.f32 %v445_v13, 0.0 }
  0xfa   : > { %882 = vmatmul.mubr.f32.gmra.mxu1 %v461_v12 }
  0xfb   : > { %v462_v16 = vmax.f32 %v440_v15, 0.0 }
  0xfd   : > { %884 = vmatprep.mubr.f32.mxu1 %v462_v16 }
  0xfe   : > { %885 = vmatmul.mubr.f32.gmra.mxu1 %v463_v17 }
 0x1a0   : > { %v865_v19 = vpop.f32.mrf.mxu0 }
 0x1a1   : > { %v559_v20 = vadd.f32 %v865_v19, %v749_v18 }
 0x1a2   : > { %v553_v21 = vpop.f32.mrf.mxu0 }
 0x1a3   : > { %633 = vst [vmem:[%s1201_s25 + $0x8] sm:$0xff] %v559_v20  ;;  %v554_v22 = vadd.f32 %v749_v18, %v553_v21 }
 0x1a5   : > { %v868_v23 = vpop.f32.mrf.mxu0  ;;  %632 = vst [vmem:[%s1201_s25] sm:$0xff] %v554_v22 }
 0x1a6   : > { %v569_v24 = vadd.f32 %v868_v23, %v749_v18 }
 0x1a7   : > { %v563_v25 = vpop.f32.mrf.mxu0 }
 0x1a8   : > { %635 = vst [vmem:[%s1201_s25 + $0x18] sm:$0xff] %v569_v24  ;;  %v564_v26 = vadd.f32 %v749_v18, %v563_v25 }
 0x1aa   : > { %v871_v27 = vpop.f32.mrf.mxu0  ;;  %634 = vst [vmem:[%s1201_s25 + $0x10] sm:$0xff] %v564_v26 }
 0x1ab   : > { %v579_v28 = vadd.f32 %v871_v27, %v749_v18 }
 0x1ac   : > { %v573_v29 = vpop.f32.mrf.mxu0 }
 0x1ad   : > { %637 = vst [vmem:[%s1201_s25 + $0x28] sm:$0xff] %v579_v28  ;;  %v574_v30 = vadd.f32 %v749_v18, %v573_v29 }
 0x1ae   : > { %v874_v31 = vpop.f32.mrf.mxu1 }
 0x1af   : > { %636 = vst [vmem:[%s1201_s25 + $0x20] sm:$0xff] %v574_v30  ;;  %v589_v32 = vadd.f32 %v874_v31, %v749_v18 }
 0x1b0   : > { %v583_v33 = vpop.f32.mrf.mxu1 }
 0x1b1   : > { %639 = vst [vmem:[%s1201_s25 + $0x38] sm:$0xff] %v589_v32  ;;  %v584_v34 = vadd.f32 %v749_v18, %v583_v33 }
 0x1b2   : > { %v877_v35 = vpop.f32.mrf.mxu1 }
 0x1b3   : > { %638 = vst [vmem:[%s1201_s25 + $0x30] sm:$0xff] %v584_v34  ;;  %v599_v36 = vadd.f32 %v877_v35, %v749_v18 }
 0x1b4   : > { %v593_v37 = vpop.f32.mrf.mxu1 }
 0x1b5   : > { %641 = vst [vmem:[%s1201_s25 + $0x48] sm:$0xff] %v599_v36  ;;  %v594_v38 = vadd.f32 %v749_v18, %v593_v37 }
 0x1b6   : > { %v880_v39 = vpop.f32.mrf.mxu1 }
 0x1b7   : > { %640 = vst [vmem:[%s1201_s25 + $0x40] sm:$0xff] %v594_v38  ;;  %v609_v40 = vadd.f32 %v880_v39, %v749_v18 }
 0x1b8   : > { %v603_v41 = vpop.f32.mrf.mxu1 }
 0x1b9   : > { %643 = vst [vmem:[%s1201_s25 + $0x58] sm:$0xff] %v609_v40  ;;  %v604_v42 = vadd.f32 %v749_v18, %v603_v41 }
 0x1ba   : > { %v883_v43 = vpop.f32.mrf.mxu1 }
 0x1bb   : > { %642 = vst [vmem:[%s1201_s25 + $0x50] sm:$0xff] %v604_v42  ;;  %v619_v44 = vadd.f32 %v883_v43, %v749_v18 }
 0x1bc   : > { %v613_v45 = vpop.f32.mrf.mxu1 }
 0x1bd   : > { %645 = vst [vmem:[%s1201_s25 + $0x68] sm:$0xff] %v619_v44  ;;  %v614_v46 = vadd.f32 %v749_v18, %v613_v45 }
 0x1be   : > { %v886_v47 = vpop.f32.mrf.mxu1 }
 0x1bf   : > { %644 = vst [vmem:[%s1201_s25 + $0x60] sm:$0xff] %v614_v46  ;;  %v629_v48 = vadd.f32 %v886_v47, %v749_v18 }
 0x1c0   : > { %v623_v49 = vpop.f32.mrf.mxu1 }
 0x1c1   : > { %647 = vst [vmem:[%s1201_s25 + $0x78] sm:$0xff] %v629_v48  ;;  %v624_v50 = vadd.f32 %v749_v18, %v623_v49 }
 0x1c3   : > { %646 = vst [vmem:[%s1201_s25 + $0x70] sm:$0xff] %v624_v50 }
 0x1c4   : > { %973 = shalt.err (!%p970_p3)
}
 0x1c5   : > { %s974_s12 = scalar_lea.hbm %s1222_s8, 2048  ;;  %s978_s15 = scalar_lea.hbm %s1275_s5, 4096 }
 0x1c6   : > { %p975_p4 = scmp.ne.s32.totalorder %s1222_s8, %s974_s12  ;;  %p979_p9 = scmp.lt.s32.totalorder %s1222_s8, %s1275_s5 }
 0x1c7   : > { %p980_p10 = scmp.lt.s32.totalorder %s978_s15, %s974_s12 }
 0x1c8   : > { %p976_p7 = pnand %p975_p4, %p1093_p5 }
 0x1c9   : > { %p981_p11 = por %p980_p10, %p979_p9 }
 0x1ca   : > { %p977_p8 = pneg %p976_p7 }
 0x1cc   : > { %p982_p12 = pnand %p981_p11, %p977_p8 }
 0x1ce   : > { %985 = shalt.err (!%p982_p12)
}
 0x1cf   : > { %s1023_s25 = smov 128   ;;  %s1024_s26 = smov 8  }
 0x1d0   : > { %919 = dma.vmem_to_hbm [thread:$0]  (%p1093_p5), %s1224_s30, 2048, %s1222_s8, %s1230_s22, %s1023_s25, %s1023_s25, %s1024_s26  }
 0x1d1 PF: > { %p925_p13 = scmp.ge.s32.totalorder %s1020_s21, 2  ;;  %s677_s6 = sand.u32 1, %s1008_s18  }
 0x1d2   : > { %s678_s7 = scalar_lea.sflag [#allocation3], %s677_s6 }
 0x1d3   : > { %p922_p0 = pnand %p925_p13, %p1097_p6 }
 0x1d5   : > { %p923_p1 = pneg %p922_p0 }
 0x1d7   : > { %1003 = dma.done.wait (%p923_p1), %s678_s7, 2048  }
 0x1d8   : > { %1005 = vsyncadd (%p923_p1), %s678_s7, 4294965248  ;;  %p15_p2 = scmp.ge.s32.totalorder %s1080_s24, 4   ;;  %s1278_s18 = smov %s1012_s19 }
 0x1d9   : > { %s1279_s19 = smov %s1016_s20  ;;  %s1280_s20 = smov %s1091_s27 }
 0x1da   : > { %s1281_s21 = smov %s1080_s24  ;;  %17 = sbr.rel (!%p15_p2) target bundleno = 3 (0x3), region = 75 }
 0x1df   :  { %683 = vsyncpa [#allocation3], 1 }
 0x1e0   :  { %685 = vsyncpa [#allocation3 + $0x1], 1 }

</bundles_post_ra>
